<compile_context>
chip_gen: v5e
topology: v5e:2x2
jax: 0.10.0
libtpu: 0.0.40
codegen_flags: <defaults>
</compile_context>

<pallas_src>
import re

import numpy as np
import jax
import jax.numpy as jnp
from jax import lax
from jax.experimental import pallas as pl
from jax.experimental.pallas import tpu as pltpu


# ----------------------------------------------------------------------------
# hardware probing helpers
# ----------------------------------------------------------------------------
def _tpu_generation():
    """Best-effort TPU generation (5, 6, 7, ...); 0 if unknown."""
    try:
        kind = jax.devices()[0].device_kind.lower()
    except Exception:
        return 0
    m = re.search(r"(\d+)", kind)
    return int(m.group(1)) if m else 0


def _vmem_capacity_bytes(gen):
    """Per-TensorCore VMEM capacity; falls back on a generation-based guess."""
    try:
        info = pltpu.get_tpu_info()
        cap = int(getattr(info, "vmem_capacity_bytes", 0))
        if cap > 0:
            return cap
    except Exception:
        pass
    return (64 << 20) if gen >= 7 else (128 << 20)


# ----------------------------------------------------------------------------
# tiling
# ----------------------------------------------------------------------------
def _kernel_vmem_bytes(tn, m, d, N2, d_v):
    """Rough per-grid-step VMEM need (f32 accounting, conservative)."""
    f32 = 4
    blocks = (m * d * tn) + (m * d * N2) + (N2 * d_v) + (tn * N2) + (tn * d_v)
    dbl = 2 * f32 * blocks          # double-buffered pipeline copies
    live = 3 * f32 * tn * N2        # s, e + one compiler temp of (tn, N2)
    return dbl + live


def _pick_n_tile(N, m, d, N2, d_v, budget):
    """Largest N-tile that fits the VMEM budget (lane/sublane friendly)."""
    if N <= 512 and _kernel_vmem_bytes(N, m, d, N2, d_v) <= budget:
        return N                    # single full-N tile
    for t in (512, 256, 128):
        if t <= N and _kernel_vmem_bytes(t, m, d, N2, d_v) <= budget:
            return t
    # Fallback: smallest aligned tile; vmem_limit_bytes is raised to cover it.
    return min(N, 128)


# ----------------------------------------------------------------------------
# kernel
# ----------------------------------------------------------------------------
def _make_mos_kernel(n_mix, inv_temperature, mxu_bf16, exp_bf16):
    mxu_dtype = jnp.bfloat16 if mxu_bf16 else jnp.float32

    def kernel(pi_ref, q_ref, k_ref, v_ref, attn_ref, out_ref):
        # pi_ref  : (B, m) f32 in SMEM (scalar prefetch)
        # q_ref   : (1, m, d, tn)   k_ref: (1, m, d, N2)   v_ref: (1, N2, d_v)
        # attn_ref: (1, tn, N2)     out_ref: (1, tn, d_v)
        b = pl.program_id(0)

        # Scale q (m*d*tn elements) instead of the (tn, N2) logits, then cast
        # MXU operands (f32 matmuls are emulated as multi-pass bf16 on the MXU).
        q = (q_ref[0] * inv_temperature).astype(mxu_dtype)   # (m, d, tn)
        k = k_ref[0].astype(mxu_dtype)                       # (m, d, N2)

        # Mixture loop unrolled at trace time (m is a tiny static constant).
        for mi in range(n_mix):
            # s[n, n2] = sum_d q[mi, d, n] * k[mi, d, n2]; f32 accumulation.
            s = lax.dot_general(
                q[mi], k[mi],
                dimension_numbers=(((0,), (0,)), ((), ())),
                preferred_element_type=jnp.float32)           # (tn, N2) f32

            # Numerically-stable softmax over the last axis (== Softmax(dim=2)).
            s = s - jnp.max(s, axis=-1, keepdims=True)
            if exp_bf16:
                # bf16 EUP (v6e/v7x) ~doubles exp throughput; sum stays f32.
                e = jnp.exp(s.astype(jnp.bfloat16)).astype(jnp.float32)
            else:
                e = jnp.exp(s)
            row_sum = jnp.sum(e, axis=-1, keepdims=True)       # (tn, 1)
            inv_l = pl.reciprocal(row_sum, approx=True)
            inv_l = inv_l * (2.0 - row_sum * inv_l)            # Newton step (tn,1)

            # Fold pi into the per-row scale -> a single (tn, N2) multiply.
            term = e * (inv_l * pi_ref[b, mi])                 # (tn, N2) f32

            # Accumulate directly into the resident output block (no acc buf).
            if mi == 0:
                attn_ref[0] = term.astype(attn_ref.dtype)
            else:
                attn_ref[0] = (attn_ref[0].astype(jnp.float32) + term
                               ).astype(attn_ref.dtype)

        # TODO(synk): nn.Dropout(attn_dropout) is identity at inference; training
        # dropout (random mask + 1/(1-p) rescale) is not implemented here.

        # out[n, dv] = attn[n, :] @ v[:, dv]; v was pre-transposed so the
        # contraction dim N2 is on sublanes (no per-step XLU transpose).
        p = attn_ref[0].astype(mxu_dtype)
        out_ref[0] = lax.dot_general(
            p, v_ref[0].astype(mxu_dtype),
            dimension_numbers=(((1,), (0,)), ((), ())),
            preferred_element_type=jnp.float32).astype(out_ref.dtype)

    return kernel


# ----------------------------------------------------------------------------
# wrapper
# ----------------------------------------------------------------------------
def mixture_of_softmax(qt, kt, vt, weight, n_mix, *,
                       use_bf16_matmul=True, attn_dtype=jnp.float32):
    """Pallas implementation of MixtureOfSoftMax.forward (inference mode).

    qt: (B, d_k, N)  kt: (B, d_k, N2)  vt: (B, d_v, N2)  weight: (n_mix, d_k)
    returns (output (B, N, d_v), attn (B, N, N2))
    Set attn_dtype=jnp.bfloat16 to halve the attn writeback traffic (v5e lever)
    when the caller tolerates a bf16 attention map.
    """
    B, d_k, N = qt.shape
    m = n_mix
    d = d_k // m
    N2 = kt.shape[2]
    d_v = vt.shape[1]
    inv_temperature = float(np.power(d_k, -0.5))

    gen = _tpu_generation()
    vmem_cap = _vmem_capacity_bytes(gen)

    # --- mixture prior pi (tiny glue: mean over N + (m x d_k) matmul + softmax)
    if m > 1:
        bar_qt = jnp.mean(qt, axis=2, keepdims=True)              # (B, d_k, 1)
        logits = jnp.einsum('md,bdo->bmo', weight, bar_qt)        # (B, m, 1)
        pi = jax.nn.softmax(logits, axis=1)[..., 0]               # (B, m)
    else:
        pi = jnp.ones((B, 1), dtype=jnp.float32)
    pi = pi.astype(jnp.float32)                                   # SMEM prefetch

    # --- layout plumbing -----------------------------------------------------
    q = qt.reshape(B, m, d, N)            # view (contiguous split of d_k)
    k = kt.reshape(B, m, d, N2)
    # One-time HBM transpose of v so the PV contraction dim (N2) is on sublanes.
    v = jnp.swapaxes(vt, 1, 2)            # (B, N2, d_v)
    if use_bf16_matmul:
        v = v.astype(jnp.bfloat16)        # also halves v HBM/VMEM traffic

    # --- VMEM-aware, generation-aware tiling ----------------------------------
    budget = min(vmem_cap // 2, 64 << 20)          # ~32 MiB on v7x, 64 MiB else
    tn = _pick_n_tile(N, m, d, N2, d_v, budget)
    nt = (N + tn - 1) // tn
    n_pad = nt * tn
    if n_pad != N:
        # Zero-pad q rows; the padded output rows of the last block are clipped
        # by Pallas (out_shape keeps the true N), so no post-kernel slicing.
        q = jnp.pad(q, ((0, 0), (0, 0), (0, 0), (0, n_pad - N)))

    needed = _kernel_vmem_bytes(tn, m, d, N2, d_v)
    vmem_limit = max(int(needed * 1.5), 32 << 20, needed + (4 << 20))
    vmem_limit = int(min(vmem_limit, vmem_cap - (2 << 20)))

    exp_bf16 = use_bf16_matmul and gen >= 6        # bf16 EUP only on v6e/v7x

    kernel = _make_mos_kernel(m, inv_temperature, use_bf16_matmul, exp_bf16)

    grid_spec = pltpu.PrefetchScalarGridSpec(
        num_scalar_prefetch=1,             # pi -> SMEM, passed to every index_map
        grid=(B, nt),
        in_specs=[
            pl.BlockSpec((1, m, d, tn), lambda b, ni, pi_: (b, 0, 0, ni)),  # q
            pl.BlockSpec((1, m, d, N2), lambda b, ni, pi_: (b, 0, 0, 0)),   # k
            pl.BlockSpec((1, N2, d_v), lambda b, ni, pi_: (b, 0, 0)),       # v^T
        ],
        out_specs=[
            pl.BlockSpec((1, tn, N2), lambda b, ni, pi_: (b, ni, 0)),       # attn
            pl.BlockSpec((1, tn, d_v), lambda b, ni, pi_: (b, ni, 0)),      # out
        ],
    )

    cost = pl.CostEstimate(
        flops=2 * B * N * N2 * (d_k + d_v),
        transcendentals=B * m * N * N2,
        bytes_accessed=4 * (B * d_k * N + B * N * N2 + B * N * d_v)
                       + 4 * nt * (B * d_k * N2 + B * N2 * d_v),
    )

    attn, output = pl.pallas_call(
        kernel,
        grid_spec=grid_spec,
        out_shape=(
            jax.ShapeDtypeStruct((B, N, N2), attn_dtype),
            jax.ShapeDtypeStruct((B, N, d_v), jnp.float32),
        ),
        compiler_params=pltpu.CompilerParams(
            # no cross-iteration dependency: both axes can shard across cores
            dimension_semantics=("parallel", "parallel"),
            vmem_limit_bytes=vmem_limit),
        cost_estimate=cost,
    )(pi, q, k, v)

    return output, attn


# ----------------------------------------------------------------------------
# plain-JAX reference (transcription of the PyTorch forward, eval mode)
# ----------------------------------------------------------------------------
def reference(qt, kt, vt, weight, n_mix):
    B, d_k, N = qt.shape
    m = n_mix
    d = d_k // m
    N2 = kt.shape[2]
    temperature = np.power(d_k, 0.5)
    if m > 1:
        bar_qt = jnp.mean(qt, axis=2, keepdims=True)
        pi = jax.nn.softmax(jnp.einsum('md,bdo->bmo', weight, bar_qt),
                            axis=1).reshape(B * m, 1, 1)
    q = qt.reshape(B * m, d, N).transpose(0, 2, 1)
    k = kt.reshape(B * m, d, N2)
    v = vt.transpose(0, 2, 1)
    attn = jnp.einsum('bnd,bdk->bnk', q, k) / temperature
    attn = jax.nn.softmax(attn, axis=2)
    if m > 1:
        attn = (attn * pi).reshape(B, m, N, N2).sum(1)
    out = jnp.einsum('bnk,bkd->bnd', attn, v)
    return out, attn


if __name__ == "__main__":
    # module config
    n_mix, d_k = 2, 32
    # small input shapes
    B, N, N2, d_v = 2, 64, 64, 32

    key = jax.random.PRNGKey(0)
    k_q, k_k, k_v, k_w = jax.random.split(key, 4)
    qt = jax.random.normal(k_q, (B, d_k, N), dtype=jnp.float32)
    kt = jax.random.normal(k_k, (B, d_k, N2), dtype=jnp.float32)
    vt = jax.random.normal(k_v, (B, d_v, N2), dtype=jnp.float32)

    # deterministic parameter init: uniform(-std, std), std = n_mix ** -0.5
    std = float(np.power(n_mix, -0.5))
    weight = jax.random.uniform(k_w, (n_mix, d_k), dtype=jnp.float32,
                                minval=-std, maxval=std)

    out, attn = mixture_of_softmax(qt, kt, vt, weight, n_mix)
    jax.block_until_ready((out, attn))

    out_ref, attn_ref = reference(qt, kt, vt, weight, n_mix)
    # Tolerances account for bf16 MXU operands, bf16 exp on v6e/v7x, and the
    # (Newton-refined) EUP reciprocal; observed errors are O(1e-3) at these
    # magnitudes, an order below a genuine structural bug.
    np.testing.assert_allclose(np.asarray(attn, dtype=np.float32),
                               np.asarray(attn_ref),
                               rtol=1e-2, atol=5e-3)
    np.testing.assert_allclose(np.asarray(out), np.asarray(out_ref),
                               rtol=1e-2, atol=1e-2)
    print("KERNEL_OK")
</pallas_src>

<mosaic_0001>
module attributes {stable_mosaic.version = 11 : i64} {
  func.func @kernel(%arg0: i32, %arg1: i32, %arg2: memref<2x2xf32, #tpu.memory_space<smem>>, %arg3: memref<1x2x16x64xf32, #tpu.memory_space<vmem>>, %arg4: memref<1x2x16x64xf32, #tpu.memory_space<vmem>>, %arg5: memref<1x64x32xbf16, #tpu.memory_space<vmem>>, %arg6: memref<1x64x64xf32, #tpu.memory_space<vmem>>, %arg7: memref<1x64x32xf32, #tpu.memory_space<vmem>>) attributes {dimension_semantics = [#tpu.dimension_semantics<parallel>, #tpu.dimension_semantics<parallel>], iteration_bounds = array<i64: 2, 1>, scalar_prefetch = 1 : i64, scratch_operands = 0 : i64, tpu.core_type = #tpu.core_type<tc>, window_params = [{transform_indices = @transform_0, window_bounds = array<i64: 1, 2, 16, 64>}, {transform_indices = @transform_1, window_bounds = array<i64: 1, 2, 16, 64>}, {transform_indices = @transform_2, window_bounds = array<i64: 1, 64, 32>}, {transform_indices = @transform_3, window_bounds = array<i64: 1, 64, 64>}, {transform_indices = @transform_4, window_bounds = array<i64: 1, 64, 32>}]} {
    %c0 = arith.constant 0 : index
    %c0_0 = arith.constant 0 : index
    %c0_1 = arith.constant 0 : index
    %c0_2 = arith.constant 0 : index
    %0 = vector.load %arg3[%c0, %c0_0, %c0_1, %c0_2] : memref<1x2x16x64xf32, #tpu.memory_space<vmem>>, vector<1x2x16x64xf32>
    %1 = vector.shape_cast %0 : vector<1x2x16x64xf32> to vector<2x16x64xf32>
    %cst = arith.constant 0.176776692 : f32
    %2 = vector.broadcast %cst : f32 to vector<2x16x64xf32>
    %3 = arith.mulf %1, %2 : vector<2x16x64xf32>
    %4 = arith.truncf %3 : vector<2x16x64xf32> to vector<2x16x64xbf16>
    %c0_3 = arith.constant 0 : index
    %c0_4 = arith.constant 0 : index
    %c0_5 = arith.constant 0 : index
    %c0_6 = arith.constant 0 : index
    %5 = vector.load %arg4[%c0_3, %c0_4, %c0_5, %c0_6] : memref<1x2x16x64xf32, #tpu.memory_space<vmem>>, vector<1x2x16x64xf32>
    %6 = vector.shape_cast %5 : vector<1x2x16x64xf32> to vector<2x16x64xf32>
    %7 = arith.truncf %6 : vector<2x16x64xf32> to vector<2x16x64xbf16>
    %8 = vector.extract_strided_slice %4 {offsets = [0, 0, 0], sizes = [1, 16, 64], strides = [1, 1, 1]} : vector<2x16x64xbf16> to vector<1x16x64xbf16>
    %9 = vector.shape_cast %8 : vector<1x16x64xbf16> to vector<16x64xbf16>
    %10 = vector.extract_strided_slice %7 {offsets = [0, 0, 0], sizes = [1, 16, 64], strides = [1, 1, 1]} : vector<2x16x64xbf16> to vector<1x16x64xbf16>
    %11 = vector.shape_cast %10 : vector<1x16x64xbf16> to vector<16x64xbf16>
    %cst_7 = arith.constant dense<0.000000e+00> : vector<64x64xf32>
    %12 = tpu.matmul %9, %11, %cst_7 {dimension_numbers = #tpu.dot_dimension_numbers<[0], [0], [1], [1], [0, 1, 1, 1], [], []>} : vector<16x64xbf16>, vector<16x64xbf16>, vector<64x64xf32> -> vector<64x64xf32>
    %cst_8 = arith.constant dense<0xFF800000> : vector<64xf32>
    %13 = vector.multi_reduction <maximumf>, %12, %cst_8 [1] : vector<64x64xf32> to vector<64xf32>
    %14 = vector.shape_cast %13 : vector<64xf32> to vector<64x1xf32>
    %15 = vector.broadcast %14 : vector<64x1xf32> to vector<64x64xf32>
    %16 = arith.subf %12, %15 : vector<64x64xf32>
    %17 = math.exp %16 : vector<64x64xf32>
    %cst_9 = arith.constant dense<0.000000e+00> : vector<64xf32>
    %18 = vector.multi_reduction <add>, %17, %cst_9 [1] : vector<64x64xf32> to vector<64xf32>
    %19 = vector.shape_cast %18 : vector<64xf32> to vector<64x1xf32>
    %20 = tpu.reciprocal %19 {approx = true} : vector<64x1xf32> -> vector<64x1xf32>
    %21 = arith.mulf %19, %20 : vector<64x1xf32>
    %cst_10 = arith.constant 2.000000e+00 : f32
    %22 = vector.broadcast %cst_10 : f32 to vector<64x1xf32>
    %23 = arith.subf %22, %21 : vector<64x1xf32>
    %24 = arith.mulf %20, %23 : vector<64x1xf32>
    %25 = arith.index_cast %arg0 : i32 to index
    %c0_11 = arith.constant 0 : index
    %26 = memref.load %arg2[%25, %c0_11] : memref<2x2xf32, #tpu.memory_space<smem>>
    %27 = vector.broadcast %26 : f32 to vector<64x1xf32>
    %28 = arith.mulf %24, %27 : vector<64x1xf32>
    %29 = vector.broadcast %28 : vector<64x1xf32> to vector<64x64xf32>
    %30 = arith.mulf %17, %29 : vector<64x64xf32>
    %c0_12 = arith.constant 0 : index
    %c0_13 = arith.constant 0 : index
    %c0_14 = arith.constant 0 : index
    %31 = vector.load %arg6[%c0_12, %c0_13, %c0_14] : memref<1x64x64xf32, #tpu.memory_space<vmem>>, vector<1x64x64xf32>
    %32 = vector.shape_cast %31 : vector<1x64x64xf32> to vector<64x64xf32>
    %33 = vector.shape_cast %30 : vector<64x64xf32> to vector<1x64x64xf32>
    tpu.vector_store %arg6[%c0_12, %c0_13, %c0_14], %33 {strides = array<i32>} : memref<1x64x64xf32, #tpu.memory_space<vmem>>, vector<1x64x64xf32>,
    %34 = vector.extract_strided_slice %4 {offsets = [1, 0, 0], sizes = [1, 16, 64], strides = [1, 1, 1]} : vector<2x16x64xbf16> to vector<1x16x64xbf16>
    %35 = vector.shape_cast %34 : vector<1x16x64xbf16> to vector<16x64xbf16>
    %36 = vector.extract_strided_slice %7 {offsets = [1, 0, 0], sizes = [1, 16, 64], strides = [1, 1, 1]} : vector<2x16x64xbf16> to vector<1x16x64xbf16>
    %37 = vector.shape_cast %36 : vector<1x16x64xbf16> to vector<16x64xbf16>
    %cst_15 = arith.constant dense<0.000000e+00> : vector<64x64xf32>
    %38 = tpu.matmul %35, %37, %cst_15 {dimension_numbers = #tpu.dot_dimension_numbers<[0], [0], [1], [1], [0, 1, 1, 1], [], []>} : vector<16x64xbf16>, vector<16x64xbf16>, vector<64x64xf32> -> vector<64x64xf32>
    %cst_16 = arith.constant dense<0xFF800000> : vector<64xf32>
    %39 = vector.multi_reduction <maximumf>, %38, %cst_16 [1] : vector<64x64xf32> to vector<64xf32>
    %40 = vector.shape_cast %39 : vector<64xf32> to vector<64x1xf32>
    %41 = vector.broadcast %40 : vector<64x1xf32> to vector<64x64xf32>
    %42 = arith.subf %38, %41 : vector<64x64xf32>
    %43 = math.exp %42 : vector<64x64xf32>
    %cst_17 = arith.constant dense<0.000000e+00> : vector<64xf32>
    %44 = vector.multi_reduction <add>, %43, %cst_17 [1] : vector<64x64xf32> to vector<64xf32>
    %45 = vector.shape_cast %44 : vector<64xf32> to vector<64x1xf32>
    %46 = tpu.reciprocal %45 {approx = true} : vector<64x1xf32> -> vector<64x1xf32>
    %47 = arith.mulf %45, %46 : vector<64x1xf32>
    %cst_18 = arith.constant 2.000000e+00 : f32
    %48 = vector.broadcast %cst_18 : f32 to vector<64x1xf32>
    %49 = arith.subf %48, %47 : vector<64x1xf32>
    %50 = arith.mulf %46, %49 : vector<64x1xf32>
    %51 = arith.index_cast %arg0 : i32 to index
    %c1 = arith.constant 1 : index
    %52 = memref.load %arg2[%51, %c1] : memref<2x2xf32, #tpu.memory_space<smem>>
    %53 = vector.broadcast %52 : f32 to vector<64x1xf32>
    %54 = arith.mulf %50, %53 : vector<64x1xf32>
    %55 = vector.broadcast %54 : vector<64x1xf32> to vector<64x64xf32>
    %56 = arith.mulf %43, %55 : vector<64x64xf32>
    %c0_19 = arith.constant 0 : index
    %c0_20 = arith.constant 0 : index
    %c0_21 = arith.constant 0 : index
    %57 = vector.load %arg6[%c0_19, %c0_20, %c0_21] : memref<1x64x64xf32, #tpu.memory_space<vmem>>, vector<1x64x64xf32>
    %58 = vector.shape_cast %57 : vector<1x64x64xf32> to vector<64x64xf32>
    %59 = arith.addf %58, %56 : vector<64x64xf32>
    %c0_22 = arith.constant 0 : index
    %c0_23 = arith.constant 0 : index
    %c0_24 = arith.constant 0 : index
    %60 = vector.load %arg6[%c0_22, %c0_23, %c0_24] : memref<1x64x64xf32, #tpu.memory_space<vmem>>, vector<1x64x64xf32>
    %61 = vector.shape_cast %60 : vector<1x64x64xf32> to vector<64x64xf32>
    %62 = vector.shape_cast %59 : vector<64x64xf32> to vector<1x64x64xf32>
    tpu.vector_store %arg6[%c0_22, %c0_23, %c0_24], %62 {strides = array<i32>} : memref<1x64x64xf32, #tpu.memory_space<vmem>>, vector<1x64x64xf32>,
    %c0_25 = arith.constant 0 : index
    %c0_26 = arith.constant 0 : index
    %c0_27 = arith.constant 0 : index
    %63 = vector.load %arg6[%c0_25, %c0_26, %c0_27] : memref<1x64x64xf32, #tpu.memory_space<vmem>>, vector<1x64x64xf32>
    %64 = vector.shape_cast %63 : vector<1x64x64xf32> to vector<64x64xf32>
    %65 = arith.truncf %64 : vector<64x64xf32> to vector<64x64xbf16>
    %c0_28 = arith.constant 0 : index
    %c0_29 = arith.constant 0 : index
    %c0_30 = arith.constant 0 : index
    %66 = vector.load %arg5[%c0_28, %c0_29, %c0_30] : memref<1x64x32xbf16, #tpu.memory_space<vmem>>, vector<1x64x32xbf16>
    %67 = vector.shape_cast %66 : vector<1x64x32xbf16> to vector<64x32xbf16>
    %cst_31 = arith.constant dense<0.000000e+00> : vector<64x32xf32>
    %68 = tpu.matmul %65, %67, %cst_31 {dimension_numbers = #tpu.dot_dimension_numbers<[1], [0], [0], [1], [0, 0, 1, 1], [], []>} : vector<64x64xbf16>, vector<64x32xbf16>, vector<64x32xf32> -> vector<64x32xf32>
    %c0_32 = arith.constant 0 : index
    %c0_33 = arith.constant 0 : index
    %c0_34 = arith.constant 0 : index
    %69 = vector.load %arg7[%c0_32, %c0_33, %c0_34] : memref<1x64x32xf32, #tpu.memory_space<vmem>>, vector<1x64x32xf32>
    %70 = vector.shape_cast %69 : vector<1x64x32xf32> to vector<64x32xf32>
    %71 = vector.shape_cast %68 : vector<64x32xf32> to vector<1x64x32xf32>
    tpu.vector_store %arg7[%c0_32, %c0_33, %c0_34], %71 {strides = array<i32>} : memref<1x64x32xf32, #tpu.memory_space<vmem>>, vector<1x64x32xf32>,
    return
  }
  func.func @transform_0(%arg0: i32, %arg1: i32, %arg2: memref<2x2xf32, #tpu.memory_space<smem>>) -> (i32, i32, i32, i32) {
    %c0_i32 = arith.constant 0 : i32
    %c0_i32_0 = arith.constant 0 : i32
    %c0_i32_1 = arith.constant 0 : i32
    return %arg0, %c0_i32, %c0_i32_0, %arg1 : i32, i32, i32, i32
  }
  func.func @transform_1(%arg0: i32, %arg1: i32, %arg2: memref<2x2xf32, #tpu.memory_space<smem>>) -> (i32, i32, i32, i32) {
    %c0_i32 = arith.constant 0 : i32
    %c0_i32_0 = arith.constant 0 : i32
    %c0_i32_1 = arith.constant 0 : i32
    %c0_i32_2 = arith.constant 0 : i32
    return %arg0, %c0_i32, %c0_i32_0, %c0_i32_1 : i32, i32, i32, i32
  }
  func.func @transform_2(%arg0: i32, %arg1: i32, %arg2: memref<2x2xf32, #tpu.memory_space<smem>>) -> (i32, i32, i32) {
    %c0_i32 = arith.constant 0 : i32
    %c0_i32_0 = arith.constant 0 : i32
    %c0_i32_1 = arith.constant 0 : i32
    return %arg0, %c0_i32, %c0_i32_0 : i32, i32, i32
  }
  func.func @transform_3(%arg0: i32, %arg1: i32, %arg2: memref<2x2xf32, #tpu.memory_space<smem>>) -> (i32, i32, i32) {
    %c0_i32 = arith.constant 0 : i32
    %c0_i32_0 = arith.constant 0 : i32
    return %arg0, %arg1, %c0_i32 : i32, i32, i32
  }
  func.func @transform_4(%arg0: i32, %arg1: i32, %arg2: memref<2x2xf32, #tpu.memory_space<smem>>) -> (i32, i32, i32) {
    %c0_i32 = arith.constant 0 : i32
    %c0_i32_0 = arith.constant 0 : i32
    return %arg0, %arg1, %c0_i32 : i32, i32, i32
  }
}

</mosaic_0001>

<bundles_post_ra>
// kernel: tpu_custom_call.1
= control target key start
LH: loop header
LB: loop body
LE: loop exit
PB: predicated region body
PF: predicated region fallthrough
CT: control target
= control target key end

     0   :  { %s1364_s21 = smov [#allocation3]   ;;  %s1780_s0 = inlined_call_operand.vmem [shape: f32[2,2], index: 0, kind: input, shape index: {}]   ;;  %s1781_s1 = inlined_call_operand.vmem [shape: f32[2,2,16,64], index: 1, kind: input, shape index: {}]   ;;  %s1782_s2 = inlined_call_operand.hbm [shape: f32[2,2,16,64], index: 2, kind: input, shape index: {}]   ;;  %s1783_s3 = inlined_call_operand.vmem [shape: bf16[2,64,32], index: 3, kind: input, shape index: {}]   ;;  %s1784_s4 = inlined_call_operand.hbm [shape: f32[2,64,64], index: 4, kind: output, shape index: {0}]   ;;  %s1785_s5 = inlined_call_operand.vmem [shape: f32[2,64,32], index: 5, kind: output, shape index: {1}]  }
   0x1   :  { %s12_s20 = sshll.u32 %s1780_s0, 4  ;;  %s13_s20 = int_to_ptr.vmem [resolvable:$true] %s12_s20 }
   0x2   :  { %15 = dma.vmem_to_smem %s13_s20, 32, %s1364_s21, [#allocation2] }
   0x3   :  { %1330 = dma.done.wait [#allocation2], 32 }
   0x4   :  { %1331 = vsyncadd [#allocation2], 4294967264 }
   0x5   :  { %18 = sfence }
   0x6   :  { %19 = vsyncpa [#allocation5], 0 }
   0x7   :  { %21 = vsyncpa [#allocation5 + $0x1], 0 }
   0x8   :  { %22 = vsyncpa [#allocation6], 0 }
   0x9   :  { %24 = vsyncpa [#allocation6 + $0x1], 0  ;;  %s1402_s22 = smov 0   ;;  %s1404_s23 = smov 0  }
   0xa   :  { %s1406_s24 = smov 0   ;;  %s1408_s25 = smov 0  }
   0xb   :  { %s1410_s26 = smov 0   ;;  %s1412_s0 = smov 0  }
   0xc LB: > { %s1032_s27 = sadd.s32 4294967295, %s1362_s0   ;;  %s1033_s28 = sadd.s32 4294967294, %s1362_s0   ;;  %s1362_s0 = sphi %s1412_s0, %s30_s0   ;;  %s1358_s26 = sphi %s1410_s26, %s1794_s26   ;;  %s1354_s25 = sphi %s1408_s25, %s1793_s25   ;;  %s1350_s24 = sphi %s1406_s24, %s1792_s24   ;;  %s1346_s23 = sphi %s1404_s23, %s1791_s23   ;;  %s1342_s22 = sphi %s1402_s22, %s1790_s22  }
   0xd   : > { %s42_s29 = sadd.s32 1, %s1358_s26  ;;  %s77_s30 = sadd.s32 1, %s1350_s24 }
   0xe   : > { %p44_p0 = scmp.ge.s32.totalorder %s42_s29, 2  ;;  %p84_p1 = scmp.ne.s32.totalorder %s1350_s24, %s1346_s23 }
   0xf   : > { %p85_p2 = scmp.eq.s32.totalorder %s1362_s0, 0  ;;  %p90_p3 = scmp.ne.s32.totalorder %s1346_s23, %s1342_s22 }
  0x10   : > { %s1796_s29 = smov (%p44_p0, %s42_s29), 0  ;;  %p91_p5 = scmp.eq.s32.totalorder %s1032_s27, 0 }
  0x11   : > { %p1443_p4 = por %p85_p2, %p84_p1  ;;  %s74_s7 = ssub.s32 %s1358_s26, %s1796_s29 }
  0x12   : > { %p142_p6 = scmp.eq.s32.totalorder %s1032_s27, 1  ;;  %p75_p7 = scmp.eq.s32.totalorder %s74_s7, 0 }
  0x13   : > { %p1449_p8 = por %p91_p5, %p90_p3  ;;  %p148_p10 = scmp.eq.s32.totalorder %s1033_s28, 1 }
  0x14   : > { %p1453_p9 = por %p142_p6, %p84_p1  ;;  %p1035_p12 = scmp.ge.s32.totalorder %s1362_s0, 2 }
  0x15   : > { %s1458_s10 = scalar_select %p75_p7, %s1350_s24, %s77_s30  }
  0x16   : > { %p1460_p11 = por %p148_p10, %p90_p3  ;;  %p1107_p13 = scmp.lt.s32.totalorder %s1362_s0, 2 }
  0x17   : > { %s207_s12 = sand.u32 1, %s1350_s24   ;;  %s1082_s14 = sshll.u32 %s1358_s26, 5 }
  0x18   : > { %s1036_s13 = sshll.u32 %s207_s12, 5  ;;  %s216_s17 = scalar_lea.hbm %s1782_s2, %s1082_s14 }
  0x19   : > { %s211_s18 = scalar_lea.vmem [#allocation4], %s1036_s13  ;;  %s217_s20 = sshll.u32 %s216_s17, 4  ;;  %s218_s20 = int_to_ptr.hbm [resolvable:$true] %s217_s20 }
  0x1a   : > { %s219_s19 = sshll.u32 %s211_s18, 4  ;;  %p1100_p0 = pnand %p1107_p13, %p1443_p4  ;;  %s220_s19 = int_to_ptr.vmem [resolvable:$true] %s219_s19 }
  0x1b   : > { %p1039_p1 = scmp.ge.s32.totalorder %s1362_s0, 1  ;;  %s208_s21 = scalar_lea.sflag [#allocation5], %s207_s12 }
  0x1c   : > { %s1365_s27 = smov 128   ;;  %s1366_s28 = smov 8  }
  0x1d   : > { %1102 = dma.hbm_to_vmem [thread:$0]  (!%p1100_p0), %s218_s20, 512, %s220_s19, %s208_s21, %s1365_s27, %s1365_s27, %s1366_s28  }
  0x1e   : > { %p235_p2 = scmp.lt.s32.totalorder %s1362_s0, 3 }
  0x20   : > { %p236_p3 = pnand %p1039_p1, %p235_p2 }
  0x21   : > { %s1476_s30 = sand.u32 (!%p236_p3), 1, %s1346_s23  }
  0x22   : > { %239 = sbr.rel (%p236_p3) target bundleno = 842 (0x34a), region = 32  ;;  %s1040_s7 = sshll.u32 (!%p236_p3), %s1476_s30, 5 }
  0x23   : > { %s242_s13 = scalar_lea.sflag (!%p236_p3), [#allocation5], %s1476_s30  ;;  %s1480_s14 = scalar_lea.vmem (!%p236_p3), [#allocation4], %s1040_s7 }
  0x27   : > { %1333 = dma.done.wait (%p1449_p8), %s242_s13, 512  }
  0x28   : > { %1335 = vsyncadd (%p1449_p8), %s242_s13, 4294966784  ;;  %p293_p4 = scmp.lt.s32.totalorder %s1354_s25, 1  ;;  %v330_v6 = vld [vmem:[%s1480_s14] sm:$0xff]  ;;  %v331_v9 = vld [vmem:[%s1480_s14 + $0x8] sm:$0xff]  ;;  %vm366_vm0 = vcmask 130048   ;;  %vm408_vm1 = vcmask 523264  }
  0x29   : > { %v334_v10 = vpack.c.bf16 %v330_v6, %v330_v6  ;;  %v335_v13 = vpack.c.bf16 %v331_v9, %v331_v9  ;;  %v332_v25 = vld [vmem:[%s1480_s14 + $0x10] sm:$0xff]  ;;  %v333_v26 = vld [vmem:[%s1480_s14 + $0x18] sm:$0xff]  ;;  %s1052_s20 = sshll.u32 %s1354_s25, 7  ;;  %s1041_s28 = sshll.u32 %s1476_s30, 6 }
  0x2a   : > { %s1488_s6 = scalar_select %p293_p4, %s1354_s25, 1  ;;  %v336_v27 = vpack.c.bf16 %v332_v25, %v332_v25  ;;  %v337_v28 = vpack.c.bf16 %v333_v26, %v333_v26 }
  0x2b   : > { %v362_v16 = vunpack.c.l.b16 %v334_v10  ;;  %v363_v19 = vunpack.c.l.b16 %v335_v13  ;;  %s514_s21 = sld [smem:[#allocation3 + %s1052_s20]]  ;;  %s713_s27 = sadd.s32 1, %s1052_s20 }
  0x2c   : > { %s1083_s12 = sshll.u32 %s1488_s6, 5  ;;  %v564_v29 = vunpack.c.l.b16 %v336_v27  ;;  %v565_v30 = vunpack.c.l.b16 %v337_v28  ;;  %s714_s7 = sld [smem:[#allocation3 + %s713_s27]] }
  0x2d   : > { %s300_s17 = scalar_lea.vmem %s1781_s1, %s1083_s12  ;;  %v364_v23 = vpack.c.b16 %v363_v19, %v362_v16  ;;  %s305_s19 = scalar_lea.vmem %s1783_s3, %s1083_s12 }
  0x2e   : > { %v318_v0 = vld [vmem:[%s300_s17] sm:$0xff]  ;;  %v319_v1 = vld [vmem:[%s300_s17 + $0x8] sm:$0xff]  ;;  %v320_v2 = vld [vmem:[%s300_s17 + $0x10] sm:$0xff]  ;;  %v566_v31 = vpack.c.b16 %v565_v30, %v564_v29  ;;  %s1643_s13 = scalar_lea.vmem [#allocation7], %s1041_s28  ;;  %s1090_s14 = sshll.u32 %s1354_s25, 6 }
  0x2f   : > { %v321_v3 = vld [vmem:[%s300_s17 + $0x18] sm:$0xff]  ;;  %v322_v4 = vmul.f32 0.17677669, %v318_v0  ;;  %v323_v5 = vmul.f32 0.17677669, %v319_v1  ;;  %386 = vmatpush.bf16.msra.mxu0 %v364_v23  ;;  %s873_s16 = scalar_lea.hbm %s1784_s4, %s1090_s14  ;;  %s874_s17 = sshll.u32 %s1643_s13, 4  ;;  %s875_s17 = int_to_ptr.vmem [resolvable:$true] %s874_s17 }
  0x30   : > { %v324_v7 = vmul.f32 0.17677669, %v320_v2  ;;  %v325_v8 = vmul.f32 0.17677669, %v321_v3  ;;  %587 = vmatpush.bf16.msra.mxu1 %v566_v31  ;;  %s876_s8 = sshll.u32 %s873_s16, 4  ;;  %s851_s18 = scalar_lea.sflag [#allocation6], %s1476_s30  ;;  %s877_s8 = int_to_ptr.hbm [resolvable:$true] %s876_s8 }
  0x31   : > { %v326_v11 = vpack.c.bf16 %v322_v4, %v322_v4  ;;  %v327_v12 = vpack.c.bf16 %v323_v5, %v323_v5  ;;  %s1298_s25 = scalar_lea.hbm %s1784_s4, 128 }
  0x32   : > { %v328_v14 = vpack.c.bf16 %v324_v7, %v324_v7  ;;  %v329_v15 = vpack.c.bf16 %v325_v8, %v325_v8 }
  0x33   : > { %v340_v17 = vunpack.c.l.b16 %v326_v11  ;;  %v341_v18 = vunpack.c.l.b16 %v327_v12 }
  0x34   : > { %v542_v20 = vunpack.c.l.b16 %v328_v14  ;;  %v543_v21 = vunpack.c.l.b16 %v329_v15 }
  0x35   : > { %v342_v22 = vpack.c.b16 %v341_v18, %v340_v17 }
  0x36   : > { %v544_v24 = vpack.c.b16 %v543_v21, %v542_v20 }
  0x38   : > { %1163 = vxpose.binary.xlu0.c.b16.start.end [1/2] (short) (narrow) %v544_v24, %v342_v22, 64 }
  0xe4   : > { %v1164_v32 = vpop.trf.xlu0 }
  0xe5   : > { %1048 = vmatmul.msk.bf16.vlgmr.msra.gmra.mxu0 %vm366_vm0, %v1164_v32 }
  0xec   : > { %v1165_v33 = vpop.trf.xlu0 }
  0xed   : > { %1053 = vmatmul.msk.bf16.vlgmr.msra.gmra.mxu1 %vm366_vm0, %v1165_v33 }
  0xf4   : > { %v1166_v34 = vpop.trf.xlu0 }
  0xf5   : > { %1049 = vmatmul.msk.bf16.gmra.mxu0 %vm366_vm0, %v1166_v34 }
  0xfc   : > { %v1167_v35 = vpop.trf.xlu0 }
  0xfd   : > { %1054 = vmatmul.msk.bf16.gmra.mxu1 %vm366_vm0, %v1167_v35 }
 0x104   : > { %v1168_v36 = vpop.trf.xlu0 }
 0x105   : > { %1050 = vmatmul.msk.bf16.gmra.mxu0 %vm366_vm0, %v1168_v36 }
 0x10c   : > { %v1169_v37 = vpop.trf.xlu0 }
 0x10d   : > { %1055 = vmatmul.msk.bf16.gmra.mxu1 %vm366_vm0, %v1169_v37 }
 0x114   : > { %v1170_v38 = vpop.trf.xlu0 }
 0x115   : > { %1051 = vmatmul.msk.bf16.gmra.mxu0 %vm366_vm0, %v1170_v38 }
 0x11c   : > { %v1171_v39 = vpop.trf.xlu0 }
 0x11d   : > { %1056 = vmatmul.msk.bf16.gmra.mxu1 %vm366_vm0, %v1171_v39 }
 0x162   : > { %v388_v40 = vpop.f32.mrf.mxu0 }
 0x163   : > { %v409_v41 = vsel %vm408_vm1, %v388_v40, -inf }
 0x164   : > { %410 = vmax.xlane.f32.xlu2 %v409_v41 }
 0x16a   : > { %v390_v42 = vpop.f32.mrf.mxu0  ;;  %v589_v43 = vpop.f32.mrf.mxu1 }
 0x16b   : > { %v412_v44 = vsel %vm408_vm1, %v390_v42, -inf  ;;  %v609_v45 = vsel %vm408_vm1, %v589_v43, -inf }
 0x16c   : > { %413 = vmax.xlane.f32.xlu1 %v412_v44  ;;  %610 = vmax.xlane.f32.xlu2 %v609_v45 }
 0x172   : > { %v393_v46 = vpop.f32.mrf.mxu0  ;;  %v591_v47 = vpop.f32.mrf.mxu1 }
 0x173   : > { %v612_v48 = vsel %vm408_vm1, %v591_v47, -inf  ;;  %v415_v49 = vsel %vm408_vm1, %v393_v46, -inf }
 0x174   : > { %613 = vmax.xlane.f32.xlu1 %v612_v48  ;;  %416 = vmax.xlane.f32.xlu0 %v415_v49 }
 0x17a   : > { %v1513_v50 = vpop.f32.mrf.mxu0  ;;  %v1515_v51 = vpop.f32.mrf.mxu1 }
 0x17b   : > { %v615_v52 = vsel %vm408_vm1, %v1515_v51, -inf  ;;  %v418_v55 = vsel %vm408_vm1, %v1513_v50, -inf }
 0x17c   : > { %616 = vmax.xlane.f32.xlu1 %v615_v52 }
 0x182   : > { %v1519_v53 = vpop.f32.mrf.mxu0  ;;  %v1521_v54 = vpop.f32.mrf.mxu1 }
 0x183   : > { %v618_v56 = vsel %vm408_vm1, %v1521_v54, -inf  ;;  %v421_v57 = vsel %vm408_vm1, %v1519_v53, -inf }
 0x184   : > { %419 = vmax.xlane.f32.xlu1 %v418_v55  ;;  %619 = vmax.xlane.f32.xlu2 %v618_v56 }
 0x18a   : > { %v1529_v58 = vpop.f32.mrf.mxu0  ;;  %v1531_v59 = vpop.f32.mrf.mxu1 }
 0x18b   : > { %v424_v60 = vsel %vm408_vm1, %v1529_v58, -inf  ;;  %v621_v61 = vsel %vm408_vm1, %v1531_v59, -inf }
 0x18c   : > { %422 = vmax.xlane.f32.xlu2 %v421_v57  ;;  %425 = vmax.xlane.f32.xlu1 %v424_v60 }
 0x192   : > { %v1537_v62 = vpop.f32.mrf.mxu0  ;;  %v1539_v63 = vpop.f32.mrf.mxu1 }
 0x193   : > { %v624_v0 = vsel %vm408_vm1, %v1539_v63, -inf  ;;  %v427_v1 = vsel %vm408_vm1, %v1537_v62, -inf }
 0x194   : > { %622 = vmax.xlane.f32.xlu2 %v621_v61  ;;  %625 = vmax.xlane.f32.xlu1 %v624_v0 }
 0x19a   : > { %v1545_v2 = vpop.f32.mrf.mxu0  ;;  %v1547_v3 = vpop.f32.mrf.mxu1 }
 0x19b   : > { %v430_v4 = vsel %vm408_vm1, %v1545_v2, -inf  ;;  %v627_v5 = vsel %vm408_vm1, %v1547_v3, -inf }
 0x19c   : > { %428 = vmax.xlane.f32.xlu2 %v427_v1  ;;  %431 = vmax.xlane.f32.xlu1 %v430_v4 }
 0x1a2   : > { %v1553_v6 = vpop.f32.mrf.mxu1 }
 0x1a3   : > { %v630_v7 = vsel %vm408_vm1, %v1553_v6, -inf }
 0x1a4   : > { %628 = vmax.xlane.f32.xlu2 %v627_v5  ;;  %631 = vmax.xlane.f32.xlu1 %v630_v7 }
 0x1d7   : > { %v411_v8 = vpop.xlane.xlu2 %410 }
 0x1d8   : > { %v433_v9 = vsub.f32 %v388_v40, %v411_v8 }
 0x1da   : > { %v441_v10 = vmul.f32 1.442695, %v433_v9 }
 0x1dc   : > { %1172 = vpow2.f32 %v441_v10 }
 0x1df   : > { %v414_v11 = vpop.xlane.xlu1 %413  ;;  %v611_v12 = vpop.xlane.xlu2 %610 }
 0x1e0   : > { %v434_v13 = vsub.f32 %v390_v42, %v414_v11  ;;  %v633_v14 = vsub.f32 %v589_v43, %v611_v12 }
 0x1e2   : > { %v1557_v15 = vpop.eup %1172  ;;  %v443_v16 = vmul.f32 1.442695, %v434_v13  ;;  %v641_v17 = vmul.f32 1.442695, %v633_v14 }
 0x1e3   : > { %v457_v18 = vsel %vm408_vm1, %v1557_v15, 0.0 }
 0x1e4   : > { %1174 = vpow2.f32 %v443_v16  ;;  %458 = vadd.xlane.f32.xlu2 %v457_v18 }
 0x1e5   : > { %1176 = vpow2.f32 %v641_v17 }
 0x1e7   : > { %v614_v19 = vpop.xlane.xlu1 %613  ;;  %v417_v20 = vpop.xlane.xlu0 %416 }
 0x1e8   : > { %v634_v21 = vsub.f32 %v591_v47, %v614_v19  ;;  %v435_v22 = vsub.f32 %v393_v46, %v417_v20 }
 0x1ea   : > { %v1561_v23 = vpop.eup %1174  ;;  %v643_v24 = vmul.f32 1.442695, %v634_v21  ;;  %v445_v25 = vmul.f32 1.442695, %v435_v22 }
 0x1eb   : > { %v1563_v26 = vpop.eup %1176  ;;  %v460_v27 = vsel %vm408_vm1, %v1561_v23, 0.0 }
 0x1ec   : > { %1178 = vpow2.f32 %v643_v24  ;;  %v657_v28 = vsel %vm408_vm1, %v1563_v26, 0.0  ;;  %461 = vadd.xlane.f32.xlu1 %v460_v27  ;;  %v1089_v27 = vld [vmem:[%s305_s19 + $0x18] sm:$0xff] }
 0x1ed   : > { %1180 = vpow2.f32 %v445_v25  ;;  %658 = vadd.xlane.f32.xlu2 %v657_v28  ;;  %816 = vmatpush.bf16.msra.mxu2 %v1089_v27 }
 0x1ee   : > { %1091 = vmatpush.bf16.msra.mxu3 %v1089_v27 }
 0x1ef   : > { %v617_v29 = vpop.xlane.xlu1 %616 }
 0x1f0   : > { %v635_v30 = vsub.f32 %v1515_v51, %v617_v29  ;;  %v1088_v29 = vld [vmem:[%s305_s19 + $0x10] sm:$0xff] }
 0x1f1   : > { %817 = vmatpush.bf16.msra.mxu2 %v1088_v29 }
 0x1f2   : > { %v1570_v31 = vpop.eup %1178  ;;  %v645_v32 = vmul.f32 1.442695, %v635_v30  ;;  %1092 = vmatpush.bf16.msra.mxu3 %v1088_v29  ;;  %v1087_v30 = vld [vmem:[%s305_s19 + $0x8] sm:$0xff] }
 0x1f3   : > { %v1572_v33 = vpop.eup %1180  ;;  %v660_v34 = vsel %vm408_vm1, %v1570_v31, 0.0 }
 0x1f4   : > { %1182 = vpow2.f32 %v645_v32  ;;  %661 = vadd.xlane.f32.xlu1 %v660_v34  ;;  %v463_v35 = vsel %vm408_vm1, %v1572_v33, 0.0 }
 0x1f5   : > { %464 = vadd.xlane.f32.xlu2 %v463_v35  ;;  %818 = vmatpush.bf16.msra.mxu2 %v1087_v30 }
 0x1f6   : > { %1093 = vmatpush.bf16.msra.mxu3 %v1087_v30 }
 0x1f7   : > { %v420_v36 = vpop.xlane.xlu1 %419  ;;  %v620_v37 = vpop.xlane.xlu2 %619 }
 0x1f8   : > { %v436_v38 = vsub.f32 %v1513_v50, %v420_v36  ;;  %v636_v41 = vsub.f32 %v1521_v54, %v620_v37 }
 0x1fa   : > { %v1579_v39 = vpop.eup %1182  ;;  %v447_v40 = vmul.f32 1.442695, %v436_v38  ;;  %v647_v43 = vmul.f32 1.442695, %v636_v41  ;;  %v1086_v38 = vld [vmem:[%s305_s19] sm:$0xff]  ;;  %s1292_s19 = sshra.s32 %s877_s8, 4  ;;  %s1293_s19 = int_to_ptr.hbm [resolvable:$true] %s1292_s19 }
 0x1fb   : > { %v663_v42 = vsel %vm408_vm1, %v1579_v39, 0.0  ;;  %819 = vmatpush.bf16.msra.mxu2 %v1086_v38  ;;  %1094 = vmatpush.bf16.msra.mxu3 %v1086_v38  ;;  %s1294_s20 = scalar_lea.hbm %s1293_s19, 64  ;;  %p1299_p8 = scmp.lt.s32.totalorder %s1293_s19, %s1784_s4 }
 0x1fc   : > { %1184 = vpow2.f32 %v447_v40  ;;  %v1638_v40 = vstv %s514_s21  ;;  %p1295_p5 = scmp.ne.s32.totalorder %s1293_s19, %s1294_s20  ;;  %p1300_p10 = scmp.lt.s32.totalorder %s1298_s25, %s1294_s20 }
 0x1fd   : > { %664 = vadd.xlane.f32.xlu2 %v663_v42  ;;  %1186 = vpow2.f32 %v647_v43 }
 0x1fe   : > { %p1296_p6 = pnand %p1295_p5, %p1453_p9  ;;  %p1301_p13 = por %p1300_p10, %p1299_p8 }
 0x1ff   : > { %v423_v44 = vpop.xlane.xlu2 %422  ;;  %v426_v45 = vpop.xlane.xlu1 %425 }
 0x200   : > { %v437_v46 = vsub.f32 %v1519_v53, %v423_v44  ;;  %v438_v49 = vsub.f32 %v1529_v58, %v426_v45  ;;  %p1297_p7 = pneg %p1296_p6 }
 0x202   : > { %v1585_v47 = vpop.eup %1184  ;;  %v449_v48 = vmul.f32 1.442695, %v437_v46  ;;  %v451_v51 = vmul.f32 1.442695, %v438_v49  ;;  %p1302_p0 = pnand %p1301_p13, %p1297_p7 }
 0x203   : > { %v466_v50 = vsel %vm408_vm1, %v1585_v47, 0.0  ;;  %v1590_v55 = vpop.eup %1186 }
 0x204   : > { %1188 = vpow2.f32 %v449_v48  ;;  %467 = vadd.xlane.f32.xlu1 %v466_v50  ;;  %v666_v58 = vsel %vm408_vm1, %v1590_v55, 0.0 }
 0x205   : > { %1190 = vpow2.f32 %v451_v51 }
 0x207   : > { %v623_v52 = vpop.xlane.xlu2 %622  ;;  %v626_v54 = vpop.xlane.xlu1 %625 }
 0x208   : > { %v637_v56 = vsub.f32 %v1531_v59, %v623_v52  ;;  %v638_v60 = vsub.f32 %v1539_v63, %v626_v54  ;;  %v1647_v54 = vstv %s714_s7 }
 0x20a   : > { %v1593_v57 = vpop.eup %1188  ;;  %v649_v53 = vmul.f32 1.442695, %v637_v56  ;;  %v651_v0 = vmul.f32 1.442695, %v638_v60 }
 0x20b   : > { %v469_v61 = vsel %vm408_vm1, %v1593_v57, 0.0  ;;  %v1600_v5 = vpop.eup %1190 }
 0x20c   : > { %1192 = vpow2.f32 %v649_v53  ;;  %667 = vadd.xlane.f32.xlu1 %v666_v58  ;;  %470 = vadd.xlane.f32.xlu2 %v469_v61  ;;  %v472_v9 = vsel %vm408_vm1, %v1600_v5, 0.0 }
 0x20d   : > { %1194 = vpow2.f32 %v651_v0 }
 0x20f   : > { %v429_v1 = vpop.xlane.xlu2 %428  ;;  %v432_v4 = vpop.xlane.xlu1 %431 }
 0x210   : > { %v439_v59 = vsub.f32 %v1537_v62, %v429_v1  ;;  %v440_v8 = vsub.f32 %v1545_v2, %v432_v4 }
 0x212   : > { %v1603_v7 = vpop.eup %1192  ;;  %v453_v63 = vmul.f32 1.442695, %v439_v59  ;;  %v455_v11 = vmul.f32 1.442695, %v440_v8 }
 0x213   : > { %v669_v10 = vsel %vm408_vm1, %v1603_v7, 0.0  ;;  %v1610_v14 = vpop.eup %1194 }
 0x214   : > { %1196 = vpow2.f32 %v453_v63  ;;  %473 = vadd.xlane.f32.xlu1 %v472_v9  ;;  %670 = vadd.xlane.f32.xlu2 %v669_v10  ;;  %v672_v18 = vsel %vm408_vm1, %v1610_v14, 0.0 }
 0x215   : > { %1198 = vpow2.f32 %v455_v11 }
 0x217   : > { %v629_v12 = vpop.xlane.xlu2 %628  ;;  %v632_v13 = vpop.xlane.xlu1 %631 }
 0x218   : > { %v639_v62 = vsub.f32 %v1547_v3, %v629_v12  ;;  %v640_v17 = vsub.f32 %v1553_v6, %v632_v13 }
 0x21a   : > { %v1613_v16 = vpop.eup %1196  ;;  %v653_v2 = vmul.f32 1.442695, %v639_v62  ;;  %v655_v20 = vmul.f32 1.442695, %v640_v17 }
 0x21b   : > { %v475_v19 = vsel %vm408_vm1, %v1613_v16, 0.0  ;;  %v1620_v21 = vpop.eup %1198 }
 0x21c   : > { %1200 = vpow2.f32 %v653_v2  ;;  %673 = vadd.xlane.f32.xlu1 %v672_v18  ;;  %476 = vadd.xlane.f32.xlu2 %v475_v19  ;;  %v478_v6 = vsel %vm408_vm1, %v1620_v21, 0.0 }
 0x21d   : > { %1202 = vpow2.f32 %v655_v20 }
 0x222   : > { %v1622_v3 = vpop.eup %1200 }
 0x223   : > { %v675_v22 = vsel %vm408_vm1, %v1622_v3, 0.0  ;;  %v1628_v24 = vpop.eup %1202 }
 0x224   : > { %479 = vadd.xlane.f32.xlu1 %v478_v6  ;;  %676 = vadd.xlane.f32.xlu2 %v675_v22  ;;  %v678_v25 = vsel %vm408_vm1, %v1628_v24, 0.0 }
 0x22c   : > { %679 = vadd.xlane.f32.xlu1 %v678_v25 }
 0x257   : > { %v459_v28 = vpop.xlane.xlu2 %458 }
 0x258   : > { %1204 = vrcp.f32 %v459_v28 }
 0x25e   : > { %v1205_v32 = vpop.eup %1204 }
 0x25f   : > { %v489_v34 = vmul.f32 %v1205_v32, %v459_v28  ;;  %v462_v35 = vpop.xlane.xlu1 %461 }
 0x260   : > { %v659_v36 = vpop.xlane.xlu2 %658  ;;  %1206 = vrcp.f32 %v462_v35 }
 0x261   : > { %v497_v37 = vsub.f32 2.0, %v489_v34  ;;  %1208 = vrcp.f32 %v659_v36 }
 0x263   : > { %v505_v41 = vmul.f32 %v1205_v32, %v497_v37 }
 0x265   : > { %v516_v42 = vmul.f32 %v1638_v40, %v505_v41 }
 0x266   : > { %v1207_v43 = vpop.eup %1206 }
 0x267   : > { %v1209_v44 = vpop.eup %1208  ;;  %v524_v45 = vmul.f32 %v1557_v15, %v516_v42  ;;  %v490_v46 = vmul.f32 %v1207_v43, %v462_v35  ;;  %v662_v48 = vpop.xlane.xlu1 %661 }
 0x268   : > { %v689_v49 = vmul.f32 %v1209_v44, %v659_v36  ;;  %1210 = vrcp.f32 %v662_v48  ;;  %v465_v50 = vpop.xlane.xlu2 %464 }
 0x269   : > { %532 = vst.msk [vmem:[%s1643_s13] sm:$0xff] %vm408_vm1, %v524_v45  ;;  %v498_v51 = vsub.f32 2.0, %v490_v46  ;;  %1212 = vrcp.f32 %v465_v50 }
 0x26a   : > { %v697_v52 = vsub.f32 2.0, %v689_v49 }
 0x26b   : > { %v506_v56 = vmul.f32 %v1207_v43, %v498_v51 }
 0x26c   : > { %v705_v53 = vmul.f32 %v1209_v44, %v697_v52 }
 0x26d   : > { %v517_v15 = vmul.f32 %v1638_v40, %v506_v56 }
 0x26e   : > { %v1211_v60 = vpop.eup %1210  ;;  %v716_v58 = vmul.f32 %v1647_v54, %v705_v53 }
 0x26f   : > { %v1213_v61 = vpop.eup %1212  ;;  %v525_v0 = vmul.f32 %v1561_v23, %v517_v15  ;;  %v690_v1 = vmul.f32 %v1211_v60, %v662_v48 }
 0x270   : > { %v732_v4 = vld [vmem:[%s1643_s13] sm:$0xff]  ;;  %v724_v59 = vmul.f32 %v1563_v26, %v716_v58  ;;  %v491_v63 = vmul.f32 %v1213_v61, %v465_v50  ;;  %v665_v8 = vpop.xlane.xlu2 %664 }
 0x271   : > { %533 = vst.msk [vmem:[%s1643_s13 + $0x8] sm:$0xff] %vm408_vm1, %v525_v0  ;;  %v698_v9 = vsub.f32 2.0, %v690_v1  ;;  %1214 = vrcp.f32 %v665_v8 }
 0x272   : > { %v740_v10 = vadd.f32 %v732_v4, %v724_v59  ;;  %v499_v11 = vsub.f32 2.0, %v491_v63 }
 0x273   : > { %v706_v12 = vmul.f32 %v1211_v60, %v698_v9 }
 0x274   : > { %748 = vst.msk [vmem:[%s1643_s13] sm:$0xff] %vm408_vm1, %v740_v10  ;;  %v507_v13 = vmul.f32 %v1213_v61, %v499_v11 }
 0x275   : > { %v717_v23 = vmul.f32 %v1647_v54, %v706_v12 }
 0x276   : > { %v518_v62 = vmul.f32 %v1638_v40, %v507_v13 }
 0x277   : > { %v1215_v26 = vpop.eup %1214  ;;  %v725_v2 = vmul.f32 %v1570_v31, %v717_v23  ;;  %v468_v17 = vpop.xlane.xlu1 %467 }
 0x278   : > { %v733_v18 = vld [vmem:[%s1643_s13 + $0x8] sm:$0xff]  ;;  %v526_v19 = vmul.f32 %v1572_v33, %v518_v62  ;;  %v691_v20 = vmul.f32 %v1215_v26, %v665_v8  ;;  %1216 = vrcp.f32 %v468_v17 }
 0x279   : > { %v741_v6 = vadd.f32 %v733_v18, %v725_v2 }
 0x27a   : > { %534 = vst.msk [vmem:[%s1643_s13 + $0x10] sm:$0xff] %vm408_vm1, %v526_v19  ;;  %v699_v22 = vsub.f32 2.0, %v691_v20 }
 0x27b   : > { %749 = vst.msk [vmem:[%s1643_s13 + $0x8] sm:$0xff] %vm408_vm1, %v741_v6  ;;  %v756_v36 = vld [vmem:[%s1643_s13] sm:$0xff] }
 0x27c   : > { %v707_v25 = vmul.f32 %v1215_v26, %v699_v22 }
 0x27e   : > { %v1217_v27 = vpop.eup %1216  ;;  %v718_v31 = vmul.f32 %v1647_v54, %v707_v25 }
 0x27f   : > { %v492_v28 = vmul.f32 %v1217_v27, %v468_v17  ;;  %v668_v29 = vpop.xlane.xlu1 %667  ;;  %v471_v30 = vpop.xlane.xlu2 %470 }
 0x280   : > { %v726_v33 = vmul.f32 %v1579_v39, %v718_v31  ;;  %1218 = vrcp.f32 %v668_v29 }
 0x281   : > { %v734_v32 = vld [vmem:[%s1643_s13 + $0x10] sm:$0xff]  ;;  %v500_v34 = vsub.f32 2.0, %v492_v28  ;;  %1220 = vrcp.f32 %v471_v30 }
 0x282   : > { %v742_v35 = vadd.f32 %v734_v32, %v726_v33  ;;  %v757_v37 = vld [vmem:[%s1643_s13 + $0x8] sm:$0xff] }
 0x283   : > { %v508_v38 = vmul.f32 %v1217_v27, %v500_v34  ;;  %v764_v41 = vpack.c.bf16 %v757_v37, %v756_v36 }
 0x284   : > { %750 = vst.msk [vmem:[%s1643_s13 + $0x10] sm:$0xff] %vm408_vm1, %v742_v35 }
 0x285   : > { %v519_v42 = vmul.f32 %v1638_v40, %v508_v38  ;;  %1073 = vmatmul.msk.bf16.vlgmr.msra.gmra.mxu2 %vm408_vm1, %v764_v41 }
 0x286   : > { %v1219_v43 = vpop.eup %1218 }
 0x287   : > { %v1221_v44 = vpop.eup %1220  ;;  %v527_v39 = vmul.f32 %v1585_v47, %v519_v42  ;;  %v692_v45 = vmul.f32 %v1219_v43, %v668_v29  ;;  %v474_v46 = vpop.xlane.xlu1 %473 }
 0x288   : > { %v671_v48 = vpop.xlane.xlu2 %670  ;;  %v493_v49 = vmul.f32 %v1221_v44, %v471_v30  ;;  %1222 = vrcp.f32 %v474_v46 }
 0x289   : > { %535 = vst.msk [vmem:[%s1643_s13 + $0x18] sm:$0xff] %vm408_vm1, %v527_v39  ;;  %v700_v50 = vsub.f32 2.0, %v692_v45  ;;  %1224 = vrcp.f32 %v671_v48 }
 0x28a   : > { %v501_v51 = vsub.f32 2.0, %v493_v49 }
 0x28b   : > { %v708_v52 = vmul.f32 %v1219_v43, %v700_v50  ;;  %v758_v27 = vld [vmem:[%s1643_s13 + $0x10] sm:$0xff] }
 0x28c   : > { %v509_v56 = vmul.f32 %v1221_v44, %v501_v51 }
 0x28d   : > { %v719_v53 = vmul.f32 %v1647_v54, %v708_v52 }
 0x28e   : > { %v1223_v15 = vpop.eup %1222  ;;  %v520_v47 = vmul.f32 %v1638_v40, %v509_v56 }
 0x28f   : > { %v1225_v60 = vpop.eup %1224  ;;  %v727_v58 = vmul.f32 %v1590_v55, %v719_v53  ;;  %v494_v61 = vmul.f32 %v1223_v15, %v474_v46  ;;  %v674_v0 = vpop.xlane.xlu1 %673 }
 0x290   : > { %v477_v1 = vpop.xlane.xlu2 %476  ;;  %v735_v4 = vld [vmem:[%s1643_s13 + $0x18] sm:$0xff]  ;;  %v528_v59 = vmul.f32 %v1593_v57, %v520_v47  ;;  %v693_v63 = vmul.f32 %v1225_v60, %v671_v48  ;;  %1226 = vrcp.f32 %v674_v0 }
 0x291   : > { %v743_v8 = vadd.f32 %v735_v4, %v727_v58  ;;  %v502_v9 = vsub.f32 2.0, %v494_v61  ;;  %1228 = vrcp.f32 %v477_v1 }
 0x292   : > { %536 = vst.msk [vmem:[%s1643_s13 + $0x20] sm:$0xff] %vm408_vm1, %v528_v59  ;;  %v701_v10 = vsub.f32 2.0, %v693_v63 }
 0x293   : > { %751 = vst.msk [vmem:[%s1643_s13 + $0x18] sm:$0xff] %vm408_vm1, %v743_v8  ;;  %v510_v11 = vmul.f32 %v1223_v15, %v502_v9 }
 0x294   : > { %v709_v55 = vmul.f32 %v1225_v60, %v701_v10 }
 0x295   : > { %v521_v12 = vmul.f32 %v1638_v40, %v510_v11 }
 0x296   : > { %v1227_v13 = vpop.eup %1226  ;;  %v720_v57 = vmul.f32 %v1647_v54, %v709_v55 }
 0x297   : > { %v1229_v23 = vpop.eup %1228  ;;  %v529_v62 = vmul.f32 %v1600_v5, %v521_v12  ;;  %v694_v26 = vmul.f32 %v1227_v13, %v674_v0  ;;  %v480_v2 = vpop.xlane.xlu1 %479 }
 0x298   : > { %v677_v17 = vpop.xlane.xlu2 %676  ;;  %v728_v18 = vmul.f32 %v1603_v7, %v720_v57  ;;  %v495_v19 = vmul.f32 %v1229_v23, %v477_v1  ;;  %1230 = vrcp.f32 %v480_v2 }
 0x299   : > { %537 = vst.msk [vmem:[%s1643_s13 + $0x28] sm:$0xff] %vm408_vm1, %v529_v62  ;;  %v736_v20 = vld [vmem:[%s1643_s13 + $0x20] sm:$0xff]  ;;  %v702_v6 = vsub.f32 2.0, %v694_v26  ;;  %1232 = vrcp.f32 %v677_v17 }
 0x29a   : > { %v744_v22 = vadd.f32 %v736_v20, %v728_v18  ;;  %v503_v25 = vsub.f32 2.0, %v495_v19  ;;  %v759_v31 = vld [vmem:[%s1643_s13 + $0x18] sm:$0xff] }
 0x29b   : > { %v710_v28 = vmul.f32 %v1227_v13, %v702_v6  ;;  %v765_v5 = vpack.c.bf16 %v759_v31, %v758_v27 }
 0x29c   : > { %752 = vst.msk [vmem:[%s1643_s13 + $0x20] sm:$0xff] %vm408_vm1, %v744_v22  ;;  %v511_v29 = vmul.f32 %v1229_v23, %v503_v25 }
 0x29d   : > { %v721_v7 = vmul.f32 %v1647_v54, %v710_v28  ;;  %1074 = vmatmul.msk.bf16.vlgmr.msra.gmra.mxu3 %vm408_vm1, %v765_v5 }
 0x29e   : > { %v1231_v30 = vpop.eup %1230  ;;  %v522_v33 = vmul.f32 %v1638_v40, %v511_v29 }
 0x29f   : > { %v1233_v32 = vpop.eup %1232  ;;  %v729_v34 = vmul.f32 %v1610_v14, %v721_v7  ;;  %v496_v35 = vmul.f32 %v1231_v30, %v480_v2  ;;  %v680_v36 = vpop.xlane.xlu1 %679 }
 0x2a0   : > { %v737_v37 = vld [vmem:[%s1643_s13 + $0x28] sm:$0xff]  ;;  %v530_v38 = vmul.f32 %v1613_v16, %v522_v33  ;;  %v695_v41 = vmul.f32 %v1233_v32, %v677_v17  ;;  %1234 = vrcp.f32 %v680_v36 }
 0x2a1   : > { %v745_v42 = vadd.f32 %v737_v37, %v729_v34  ;;  %v504_v43 = vsub.f32 2.0, %v496_v35 }
 0x2a2   : > { %538 = vst.msk [vmem:[%s1643_s13 + $0x30] sm:$0xff] %vm408_vm1, %v530_v38  ;;  %v703_v44 = vsub.f32 2.0, %v695_v41 }
 0x2a3   : > { %753 = vst.msk [vmem:[%s1643_s13 + $0x28] sm:$0xff] %vm408_vm1, %v745_v42  ;;  %v512_v39 = vmul.f32 %v1231_v30, %v504_v43  ;;  %v760_v53 = vld [vmem:[%s1643_s13 + $0x20] sm:$0xff] }
 0x2a4   : > { %v711_v14 = vmul.f32 %v1233_v32, %v703_v44 }
 0x2a5   : > { %v523_v45 = vmul.f32 %v1638_v40, %v512_v39 }
 0x2a6   : > { %v1235_v46 = vpop.eup %1234  ;;  %v722_v16 = vmul.f32 %v1647_v54, %v711_v14 }
 0x2a7   : > { %v531_v48 = vmul.f32 %v1620_v21, %v523_v45  ;;  %v696_v49 = vmul.f32 %v1235_v46, %v680_v36 }
 0x2a8   : > { %v730_v50 = vmul.f32 %v1622_v3, %v722_v16 }
 0x2a9   : > { %539 = vst.msk [vmem:[%s1643_s13 + $0x38] sm:$0xff] %vm408_vm1, %v531_v48  ;;  %v738_v51 = vld [vmem:[%s1643_s13 + $0x30] sm:$0xff]  ;;  %v704_v52 = vsub.f32 2.0, %v696_v49 }
 0x2aa   : > { %v746_v56 = vadd.f32 %v738_v51, %v730_v50  ;;  %v761_v40 = vld [vmem:[%s1643_s13 + $0x28] sm:$0xff] }
 0x2ab   : > { %v712_v15 = vmul.f32 %v1235_v46, %v704_v52  ;;  %v766_v47 = vpack.c.bf16 %v761_v40, %v760_v53 }
 0x2ac   : > { %754 = vst.msk [vmem:[%s1643_s13 + $0x30] sm:$0xff] %vm408_vm1, %v746_v56 }
 0x2ad   : > { %v723_v21 = vmul.f32 %v1647_v54, %v712_v15  ;;  %1075 = vmatmul.msk.bf16.gmra.mxu3 %vm408_vm1, %v766_v47 }
 0x2af   : > { %v731_v3 = vmul.f32 %v1628_v24, %v723_v21 }
 0x2b0   : > { %v739_v60 = vld [vmem:[%s1643_s13 + $0x38] sm:$0xff] }
 0x2b1   : > { %v747_v58 = vadd.f32 %v739_v60, %v731_v3 }
 0x2b3   : > { %755 = vst.msk [vmem:[%s1643_s13 + $0x38] sm:$0xff] %vm408_vm1, %v747_v58  ;;  %v762_v61 = vld [vmem:[%s1643_s13 + $0x30] sm:$0xff] }
 0x2ba   : > { %v763_v0 = vld [vmem:[%s1643_s13 + $0x38] sm:$0xff] }
 0x2bb   : > { %v767_v1 = vpack.c.bf16 %v763_v0, %v762_v61 }
 0x2bd   : > { %1076 = vmatmul.msk.bf16.gmra.mxu3 %vm408_vm1, %v767_v1 }
 0x2be   : > { %1305 = shalt.err (!%p1302_p0)
}
 0x2bf   : > { %s1367_s30 = smov 128   ;;  %s1368_s13 = smov 8   ;;  %vm841_vm2 = vcmask 261120  }
 0x2c0   : > { %1097 = dma.vmem_to_hbm [thread:$0]  (%p1453_p9), %s875_s17, 1024, %s877_s8, %s851_s18, %s1367_s30, %s1367_s30, %s1368_s13  }
 0x2c1   : > { %s1085_s14 = sshll.u32 %s1488_s6, 6 }
 0x2c2   : > { %s315_s16 = scalar_lea.vmem %s1785_s5, %s1085_s14 }
 0x308   : > { %v821_v24 = vpop.f32.mrf.mxu2 }
 0x309   : > { %842 = vst.msk [vmem:[%s315_s16] sm:$0xff] %vm841_vm2, %v821_v24 }
 0x310   : > { %v823_v54 = vpop.f32.mrf.mxu2 }
 0x311   : > { %843 = vst.msk [vmem:[%s315_s16 + $0x8] sm:$0xff] %vm841_vm2, %v823_v54 }
 0x320   : > { %v826_v4 = vpop.f32.mrf.mxu3 }
 0x321   : > { %844 = vst.msk [vmem:[%s315_s16 + $0x10] sm:$0xff] %vm841_vm2, %v826_v4 }
 0x328   : > { %v828_v59 = vpop.f32.mrf.mxu3 }
 0x329   : > { %845 = vst.msk [vmem:[%s315_s16 + $0x18] sm:$0xff] %vm841_vm2, %v828_v59 }
 0x330   : > { %v831_v63 = vpop.f32.mrf.mxu3 }
 0x331   : > { %846 = vst.msk [vmem:[%s315_s16 + $0x20] sm:$0xff] %vm841_vm2, %v831_v63 }
 0x338   : > { %v833_v8 = vpop.f32.mrf.mxu3 }
 0x339   : > { %847 = vst.msk [vmem:[%s315_s16 + $0x28] sm:$0xff] %vm841_vm2, %v833_v8 }
 0x340   : > { %v836_v9 = vpop.f32.mrf.mxu3 }
 0x341   : > { %848 = vst.msk [vmem:[%s315_s16 + $0x30] sm:$0xff] %vm841_vm2, %v836_v9 }
 0x348   : > { %v838_v10 = vpop.f32.mrf.mxu3 }
 0x349   : > { %849 = vst.msk [vmem:[%s315_s16 + $0x38] sm:$0xff] %vm841_vm2, %v838_v10 }
 0x34a PF: > { %s895_s9 = sand.u32 1, %s1342_s22   ;;  %p1104_p9 = pnand %p1035_p12, %p1460_p11 }
 0x34b   : > { %s896_s6 = scalar_lea.sflag [#allocation6], %s895_s9 }
 0x34c   : > { %p1105_p1 = pneg %p1104_p9 }
 0x34e   : > { %1337 = dma.done.wait (%p1105_p1), %s896_s6, 1024  }
 0x34f   : > { %1339 = vsyncadd (%p1105_p1), %s896_s6, 4294966272  ;;  %s30_s0 = sadd.s32 1, %s1362_s0   ;;  %s1790_s22 = smov %s1346_s23 }
 0x350   : > { %p27_p2 = scmp.ge.s32.totalorder %s30_s0, 4   ;;  %s1791_s23 = smov %s1350_s24 }
 0x351   : > { %s1792_s24 = smov %s1458_s10  ;;  %s1793_s25 = smov %s1358_s26 }
 0x352   : > { %s1794_s26 = smov %s1796_s29  ;;  %29 = sbr.rel (!%p27_p2) target bundleno = 12 (0xc), region = 95 }
 0x357   :  { %914 = vsyncpa [#allocation5], 1 }
 0x358   :  { %916 = vsyncpa [#allocation5 + $0x1], 1 }
 0x359   :  { %917 = vsyncpa [#allocation6], 1 }
 0x35a   :  { %919 = vsyncpa [#allocation6 + $0x1], 1 }

</bundles_post_ra>
